<compile_context>
chip_gen: v7x
topology: tpu7x:2x2x1
jax: 0.10.0
libtpu: 0.0.40
codegen_flags: <defaults>
</compile_context>

<pallas_src>
import functools

import jax
import jax.numpy as jnp
from jax.experimental import pallas as pl
from jax.experimental.pallas import tpu as pltpu

LANES = 128
TARGET_BLOCK_ROWS = 2048  # 2048 * 128 * 4 B = 1 MiB per f32 input tile


def _round_up(x, m):
    return ((x + m - 1) // m) * m


def _rmse_kernel(pred_ref, true_ref, out_ref, acc_ref, *, total_n,
                 block_rows, needs_mask):
    i = pl.program_id(0)

    @pl.when(i == 0)
    def _init():
        acc_ref[...] = jnp.zeros_like(acc_ref)

    # Cast on already-loaded vregs (free for a mem-bound op).
    d = pred_ref[...].astype(jnp.float32) - true_ref[...].astype(jnp.float32)

    if needs_mask:
        # Zero out positions past the true element count (ragged tail and the
        # garbage region of a partial trailing block).
        row_ids = (jax.lax.broadcasted_iota(jnp.int32, d.shape, 0)
                   + i * block_rows)
        col_ids = jax.lax.broadcasted_iota(jnp.int32, d.shape, 1)
        elem_ids = row_ids * LANES + col_ids
        d = jnp.where(elem_ids < total_n, d, 0.0)

    sq = d * d
    if block_rows % 8 == 0:
        # Fold the (block_rows, 128) tile into the (8, 128) accumulator with
        # pure vreg adds on the VPU; no per-step cross-lane reduction.
        acc_ref[...] += jnp.sum(sq.reshape(-1, 8, LANES), axis=0)
    else:
        acc_ref[...] += sq  # tiny-input path (block equals full array)

    @pl.when(i == pl.num_programs(0) - 1)
    def _finalize():
        sse = jnp.sum(acc_ref[...], keepdims=True)  # (1, 1): one XLU reduce
        out_ref[...] = jnp.sqrt(sse / jnp.float32(total_n))


def rmse_loss(y_pred, y_true):
    """sqrt(mean((y_pred - y_true)**2)) over all elements (scalar).

    Matches torch.sqrt(nn.MSELoss()(y_pred, y_true)).
    """
    assert y_pred.shape == y_true.shape, "RMSELoss expects matching shapes"
    total_n = y_pred.size
    assert total_n > 0

    # Keep native dtype (e.g. bf16) going into the kernel: no HBM-doubling cast.
    flat_pred = jnp.ravel(y_pred)
    flat_true = jnp.ravel(y_true)

    # Minimal pad only when the count isn't lane-aligned (needed so the 2-D
    # reshape is legal); everything else is handled by in-kernel masking.
    lane_padded = _round_up(total_n, LANES)
    if lane_padded != total_n:
        flat_pred = jnp.pad(flat_pred, (0, lane_padded - total_n))
        flat_true = jnp.pad(flat_true, (0, lane_padded - total_n))

    rows = lane_padded // LANES
    if rows >= 8:
        block_rows = min(TARGET_BLOCK_ROWS, (rows // 8) * 8)
    else:
        block_rows = rows  # block equals full array dims (tiny input)
    grid = (pl.cdiv(rows, block_rows),)
    needs_mask = (lane_padded != total_n) or (rows % block_rows != 0)
    acc_rows = 8 if block_rows % 8 == 0 else block_rows

    pred2d = flat_pred.reshape(rows, LANES)
    true2d = flat_true.reshape(rows, LANES)

    kernel = functools.partial(_rmse_kernel, total_n=total_n,
                               block_rows=block_rows, needs_mask=needs_mask)

    # TODO(synk): on v7x, shard the reduction across both TensorCores with a
    # leading "parallel" grid axis and per-core partial sums combined outside.
    out = pl.pallas_call(
        kernel,
        out_shape=jax.ShapeDtypeStruct((1, 1), jnp.float32),
        grid_spec=pltpu.PrefetchScalarGridSpec(
            num_scalar_prefetch=0,
            grid=grid,
            in_specs=[
                pl.BlockSpec((block_rows, LANES), lambda i: (i, 0)),
                pl.BlockSpec((block_rows, LANES), lambda i: (i, 0)),
            ],
            out_specs=pl.BlockSpec((1, 1), lambda i: (0, 0)),
            scratch_shapes=[pltpu.VMEM((acc_rows, LANES), jnp.float32)],
        ),
        compiler_params=pltpu.CompilerParams(
            dimension_semantics=("arbitrary",),  # sequential reduction axis
        ),
    )(pred2d, true2d)

    return out[0, 0]


if __name__ == "__main__":
    key = jax.random.PRNGKey(0)
    k1, k2 = jax.random.split(key)

    # Primary check: NCHW-like shape consistent with the PyTorch call site.
    shape = (2, 4, 16, 16)
    y_pred = jax.random.normal(k1, shape, dtype=jnp.float32)
    y_true = jax.random.normal(k2, shape, dtype=jnp.float32)

    loss = jax.block_until_ready(rmse_loss(y_pred, y_true))
    ref = jnp.sqrt(jnp.mean((y_pred - y_true) ** 2))
    assert jnp.allclose(loss, ref, rtol=1e-5, atol=1e-6), (loss, ref)

    # Ragged / non-lane-aligned shape exercises the in-kernel mask path.
    k3, k4 = jax.random.split(k2)
    a = jax.random.normal(k3, (3, 5, 7), dtype=jnp.float32)
    b = jax.random.normal(k4, (3, 5, 7), dtype=jnp.float32)
    loss2 = jax.block_until_ready(rmse_loss(a, b))
    ref2 = jnp.sqrt(jnp.mean((a - b) ** 2))
    assert jnp.allclose(loss2, ref2, rtol=1e-5, atol=1e-6), (loss2, ref2)

    print("KERNEL_OK")
</pallas_src>

<mosaic_0001>
module attributes {stable_mosaic.version = 11 : i64} {
  func.func @_rmse_kernel(%arg0: i32, %arg1: memref<16x128xf32, #tpu.memory_space<vmem>>, %arg2: memref<16x128xf32, #tpu.memory_space<vmem>>, %arg3: memref<1x1xf32, #tpu.memory_space<vmem>>, %arg4: memref<8x128xf32, #tpu.memory_space<vmem>>) attributes {dimension_semantics = [#tpu.dimension_semantics<arbitrary>], iteration_bounds = array<i64: 1>, scalar_prefetch = 0 : i64, scratch_operands = 1 : i64, tpu.core_type = #tpu.core_type<tc>, window_params = [{transform_indices = @transform_0, window_bounds = array<i64: 16, 128>}, {transform_indices = @transform_1, window_bounds = array<i64: 16, 128>}, {pipeline_mode = #tpu.pipeline_mode<synchronous>, transform_indices = @transform_2, window_bounds = array<i64: 1, 1>}]} {
    %c0_i32 = arith.constant 0 : i32
    %0 = arith.cmpi eq, %arg0, %c0_i32 : i32
    %1 = arith.extui %0 : i1 to i32
    %c0_i32_0 = arith.constant 0 : i32
    %2 = arith.cmpi ne, %1, %c0_i32_0 : i32
    scf.if %2 {
      %cst_10 = arith.constant 0.000000e+00 : f32
      %15 = vector.broadcast %cst_10 : f32 to vector<8x128xf32>
      %c0_11 = arith.constant 0 : index
      %c0_12 = arith.constant 0 : index
      %16 = vector.load %arg4[%c0_11, %c0_12] : memref<8x128xf32, #tpu.memory_space<vmem>>, vector<8x128xf32>
      tpu.vector_store %arg4[%c0_11, %c0_12], %15 {strides = array<i32>} : memref<8x128xf32, #tpu.memory_space<vmem>>, vector<8x128xf32>,
    } else {
    }
    %c0 = arith.constant 0 : index
    %c0_1 = arith.constant 0 : index
    %3 = vector.load %arg1[%c0, %c0_1] : memref<16x128xf32, #tpu.memory_space<vmem>>, vector<16x128xf32>
    %c0_2 = arith.constant 0 : index
    %c0_3 = arith.constant 0 : index
    %4 = vector.load %arg2[%c0_2, %c0_3] : memref<16x128xf32, #tpu.memory_space<vmem>>, vector<16x128xf32>
    %5 = arith.subf %3, %4 : vector<16x128xf32>
    %6 = arith.mulf %5, %5 : vector<16x128xf32>
    %c0_4 = arith.constant 0 : index
    %c0_5 = arith.constant 0 : index
    %7 = vector.load %arg4[%c0_4, %c0_5] : memref<8x128xf32, #tpu.memory_space<vmem>>, vector<8x128xf32>
    %8 = vector.shape_cast %6 : vector<16x128xf32> to vector<2x8x128xf32>
    %cst = arith.constant dense<0.000000e+00> : vector<8x128xf32>
    %9 = vector.multi_reduction <add>, %8, %cst [0] : vector<2x8x128xf32> to vector<8x128xf32>
    %10 = arith.addf %7, %9 : vector<8x128xf32>
    %c0_6 = arith.constant 0 : index
    %c0_7 = arith.constant 0 : index
    %11 = vector.load %arg4[%c0_6, %c0_7] : memref<8x128xf32, #tpu.memory_space<vmem>>, vector<8x128xf32>
    tpu.vector_store %arg4[%c0_6, %c0_7], %10 {strides = array<i32>} : memref<8x128xf32, #tpu.memory_space<vmem>>, vector<8x128xf32>,
    %c0_i32_8 = arith.constant 0 : i32
    %12 = arith.cmpi eq, %arg0, %c0_i32_8 : i32
    %13 = arith.extui %12 : i1 to i32
    %c0_i32_9 = arith.constant 0 : i32
    %14 = arith.cmpi ne, %13, %c0_i32_9 : i32
    scf.if %14 {
      %c0_10 = arith.constant 0 : index
      %c0_11 = arith.constant 0 : index
      %15 = vector.load %arg4[%c0_10, %c0_11] : memref<8x128xf32, #tpu.memory_space<vmem>>, vector<8x128xf32>
      %16 = vector.shape_cast %15 : vector<8x128xf32> to vector<1x8x128xf32>
      %cst_12 = arith.constant dense<0.000000e+00> : vector<1xf32>
      %17 = vector.multi_reduction <add>, %16, %cst_12 [1, 2] : vector<1x8x128xf32> to vector<1xf32>
      %18 = vector.shape_cast %17 : vector<1xf32> to vector<1x1x1xf32>
      %19 = vector.extract %18[0, 0, 0] : f32 from vector<1x1x1xf32>
      %20 = vector.broadcast %19 : f32 to vector<1x1xf32>
      %cst_13 = arith.constant 2.048000e+03 : f32
      %21 = vector.broadcast %cst_13 : f32 to vector<1x1xf32>
      %22 = arith.divf %20, %21 : vector<1x1xf32>
      %23 = math.sqrt %22 : vector<1x1xf32>
      %c0_14 = arith.constant 0 : index
      %c0_15 = arith.constant 0 : index
      %24 = vector.load %arg3[%c0_14, %c0_15] : memref<1x1xf32, #tpu.memory_space<vmem>>, vector<1x1xf32>
      tpu.vector_store %arg3[%c0_14, %c0_15], %23 {strides = array<i32>} : memref<1x1xf32, #tpu.memory_space<vmem>>, vector<1x1xf32>,
    } else {
    }
    return
  }
  func.func @transform_0(%arg0: i32) -> (i32, i32) {
    %c0_i32 = arith.constant 0 : i32
    %c0_i32_0 = arith.constant 0 : i32
    return %arg0, %c0_i32 : i32, i32
  }
  func.func @transform_1(%arg0: i32) -> (i32, i32) {
    %c0_i32 = arith.constant 0 : i32
    %c0_i32_0 = arith.constant 0 : i32
    return %arg0, %c0_i32 : i32, i32
  }
  func.func @transform_2(%arg0: i32) -> (i32, i32) {
    %c0_i32 = arith.constant 0 : i32
    %c0_i32_0 = arith.constant 0 : i32
    %c0_i32_1 = arith.constant 0 : i32
    return %c0_i32, %c0_i32_0 : i32, i32
  }
}

</mosaic_0001>

<bundles_post_ra>
// kernel: tpu_custom_call.1
= control target key start
LH: loop header
LB: loop body
LE: loop exit
PB: predicated region body
PF: predicated region fallthrough
CT: control target
= control target key end

     0   :  { %7 = vsyncpa [#allocation4], 0  ;;  %s235_s0 = inlined_call_operand.hbm [shape: f32[16,128], index: 0, kind: input, shape index: {}]   ;;  %s236_s1 = inlined_call_operand.hbm [shape: f32[16,128], index: 1, kind: input, shape index: {}]   ;;  %s237_s2 = inlined_call_operand.hbm [shape: f32[1,1], index: 2, kind: output, shape index: {}]  }
   0x1   :  { %8 = vsyncpa [#allocation7], 0 }
   0x2   :  { %9 = vsyncpa [#allocation5], 0  ;;  %s179_s9 = smov [#allocation3]   ;;  %s107_s13 = scalar_lea.hbm %s235_s0, 256 }
   0x3   :  { %s15_s10 = sshll.u32 %s179_s9, 4  ;;  %p108_p0 = scmp.ne.s32.totalorder %s235_s0, %s107_s13  ;;  %s16_s10 = int_to_ptr.vmem [resolvable:$true] %s15_s10 }
   0x4   :  { %p111_p1 = scmp.lt.u32.totalorder %s107_s13, %s235_s0 }
   0x6   :  { %p113_p2 = pnand %p111_p1, %p108_p0 }
   0x8   :  { %116 = shalt.err (!%p113_p2)
}
   0x9   :  { %s117_s18 = scalar_lea.vmem %s16_s10, 256  ;;  %p122_p4 = scmp.lt.s32.totalorder %s16_s10, %s16_s10 }
   0xa   :  { %p118_p3 = scmp.ne.s32.totalorder %s16_s10, %s117_s18  ;;  %p123_p5 = scmp.lt.s32.totalorder %s117_s18, %s117_s18 }
   0xc   :  { %p124_p6 = por %p123_p5, %p122_p4 }
   0xe   :  { %p125_p7 = pnand %p124_p6, %p118_p3 }
  0x10   :  { %128 = shalt.err (!%p125_p7)
}
  0x11   :  { %s180_s19 = smov 128   ;;  %s181_s20 = smov 8  }
  0x12   :  { %21 = dma.hbm_to_vmem [thread:$0]  %s235_s0, 256, %s16_s10, [#allocation4], %s180_s19, %s180_s19, %s181_s20  }
  0x13   :  { %s182_s23 = smov [#allocation6]   ;;  %s129_s27 = scalar_lea.hbm %s236_s1, 256 }
  0x14   :  { %s27_s24 = sshll.u32 %s182_s23, 4  ;;  %p130_p8 = scmp.ne.s32.totalorder %s236_s1, %s129_s27  ;;  %s28_s24 = int_to_ptr.vmem [resolvable:$true] %s27_s24 }
  0x15   :  { %p133_p9 = scmp.lt.u32.totalorder %s129_s27, %s236_s1 }
  0x17   :  { %p135_p10 = pnand %p133_p9, %p130_p8 }
  0x19   :  { %138 = shalt.err (!%p135_p10)
}
  0x1a   :  { %s139_s4 = scalar_lea.vmem %s28_s24, 256  ;;  %p144_p12 = scmp.lt.s32.totalorder %s28_s24, %s28_s24 }
  0x1b   :  { %p140_p11 = scmp.ne.s32.totalorder %s28_s24, %s139_s4  ;;  %p145_p13 = scmp.lt.s32.totalorder %s139_s4, %s139_s4 }
  0x1d   :  { %p146_p0 = por %p145_p13, %p144_p12 }
  0x1f   :  { %p147_p1 = pnand %p146_p0, %p140_p11 }
  0x21   :  { %150 = shalt.err (!%p147_p1)
}
  0x22   :  { %33 = dma.hbm_to_vmem [thread:$0]  %s236_s1, 256, %s28_s24, [#allocation7], %s180_s19, %s180_s19, %s181_s20  }
  0x23   :  { %173 = dma.done.wait [#allocation4], 256  }
  0x24   :  { %174 = vsyncadd [#allocation4], 4294967040 }
  0x25   :  { %175 = dma.done.wait [#allocation7], 256  }
  0x26   :  { %176 = vsyncadd [#allocation7], 4294967040  ;;  %v45_v0 = vld [vmem:[#allocation3] sm:$0xff]  ;;  %v46_v1 = vld [vmem:[#allocation3 + $0x8] sm:$0xff]  ;;  %s183_s6 = smov [#allocation8]   ;;  %vm80_vm1 = vcmask 0  }
  0x27   :  { %v47_v2 = vld [vmem:[#allocation6] sm:$0xff]  ;;  %v48_v3 = vld [vmem:[#allocation6 + $0x8] sm:$0xff]  ;;  %s88_s7 = sshll.u32 %s183_s6, 4  ;;  %s89_s7 = int_to_ptr.vmem [resolvable:$true] %s88_s7 }
  0x28   :  { %v49_v4 = vsub.f32 %v45_v0, %v47_v2  ;;  %v50_v5 = vsub.f32 %v46_v1, %v48_v3  ;;  %s151_s8 = scalar_lea.vmem %s89_s7, 16  ;;  %s155_s9 = scalar_lea.vmem %s89_s7, 32 }
  0x29   :  { %p152_p2 = scmp.ne.s32.totalorder %s89_s7, %s151_s8  ;;  %p156_p3 = scmp.lt.s32.totalorder %s89_s7, %s89_s7 }
  0x2a   :  { %v51_v6 = vmul.f32 %v49_v4, %v49_v4  ;;  %v52_v7 = vmul.f32 %v50_v5, %v50_v5  ;;  %p157_p4 = scmp.lt.s32.totalorder %s155_s9, %s151_s8 }
  0x2c   :  { %v54_v8 = vadd.f32 %v52_v7, %v51_v6  ;;  %p158_p5 = por %p157_p4, %p156_p3 }
  0x2e   :  { %61 = vadd.xlane.f32.xlu0 %v54_v8  ;;  %p159_p6 = pnand %p158_p5, %p152_p2 }
  0xbb   :  { %v62_v9 = vpop.xlane.xlu0 %61 }
  0xbc   :  { %v63_v10 = vrot.slane %v62_v9, 4 }
  0xbe   :  { %v64_v11 = vadd.f32 %v63_v10, %v62_v9 }
  0xc0   :  { %v65_v12 = vrot.slane %v64_v11, 2 }
  0xc2   :  { %v66_v13 = vadd.f32 %v65_v12, %v64_v11 }
  0xc4   :  { %v67_v14 = vrot.slane %v66_v13, 1 }
  0xc6   :  { %v68_v15 = vadd.f32 %v67_v14, %v66_v13 }
  0xc8   :  { %98 = vpush %v68_v15 }
  0xf9   :  { %s99_s1 = spop %98 }
  0xfa   :  { %v70_v16 = vstv %s99_s1 }
  0xfb   :  { %v72_v17 = vmul.f32 0.00048828125, %v70_v16 }
  0xfd   :  { %105 = vrsqrt.f32 %v72_v17  ;;  %vm75_vm0 = vcmp.eq.f32.partialorder %v72_v17, inf  ;;  %v78_v20 = vand.u32 2147483648, %v72_v17  ;;  %vm77_vm2 = vcmp.eq.f32.partialorder %v72_v17, 0.0 }
 0x107   :  { %v106_v18 = vpop.eup %105 }
 0x108   :  { %v74_v19 = vmul.f32 %v106_v18, %v72_v17 }
 0x10a   :  { %v76_v21 = vsel %vm75_vm0, %v72_v17, %v74_v19 }
 0x10b   :  { %v79_v22 = vsel %vm77_vm2, %v78_v20, %v76_v21 }
 0x10c   :  { %81 = vst.msk [vmem:[#allocation8] sm:$0x1] %vm80_vm1, %v79_v22 }
 0x10d   :  { %162 = shalt.err (!%p159_p6)
}
 0x10e   :  { %s163_s12 = scalar_lea.hbm %s237_s2, 16 }
 0x10f   :  { %p164_p7 = scmp.ne.s32.totalorder %s237_s2, %s163_s12  ;;  %p167_p8 = scmp.lt.u32.totalorder %s163_s12, %s237_s2 }
 0x111   :  { %p169_p9 = pnand %p167_p8, %p164_p7 }
 0x113   :  { %172 = shalt.err (!%p169_p9)
}
 0x114   :  { %91 = dma.vmem_to_hbm [thread:$0]  %s89_s7, 16, %s237_s2, [#allocation5]  }
 0x115   :  { %177 = dma.done.wait [#allocation5], 16  }
 0x116   :  { %178 = vsyncadd [#allocation5], 4294967280 }
 0x117   :  { %95 = vsyncpa [#allocation4], 1 }
 0x118   :  { %96 = vsyncpa [#allocation7], 1 }
 0x119   :  { %97 = vsyncpa [#allocation5], 1 }

</bundles_post_ra>
